<compile_context>
chip_gen: v5e
topology: v5e:2x2
jax: 0.10.0
libtpu: 0.0.40
codegen_flags: <defaults>
</compile_context>

<pallas_src>
import functools

import jax
import jax.numpy as jnp
from jax import lax
from jax.experimental import pallas as pl
from jax.experimental.pallas import tpu as pltpu


def _round_up(x, m):
    return (x + m - 1) // m * m


def _multilabel_embed_kernel(labels_ref, mask_ref, emb_ref, out_ref, acc_ref,
                             *, tile_v, num_slots):
    k = pl.program_id(1)            # V-tile (reduction) index, last grid axis

    @pl.when(k == 0)
    def _init():
        acc_ref[...] = jnp.zeros_like(acc_ref)

    lab = labels_ref[...]           # (tB, L) int32, lane-major
    msk = mask_ref[...]             # (tB, L) float32
    e_tile = emb_ref[...]           # (tV, D_pad) float32 (streamed tile)

    tb = lab.shape[0]
    v_base = k * tile_v
    iota_v = lax.broadcasted_iota(jnp.int32, (tb, tile_v), 1) + v_base

    # Masked label histogram for this V tile (VPU only, no sel matrix):
    #   C[b, v] = sum_l mask[b, l] * (labels[b, l] == v_base + v)
    c = jnp.zeros((tb, tile_v), jnp.float32)
    for l in range(num_slots):      # L is a small compile-time constant
        lab_l = lab[:, l:l + 1]     # (tB, 1)
        msk_l = msk[:, l:l + 1]     # (tB, 1)
        c = c + jnp.where(lab_l == iota_v, msk_l, jnp.float32(0.0))

    # Single MXU matmul per step, accumulated across the V reduction axis.
    acc_ref[...] += jnp.dot(c, e_tile, preferred_element_type=jnp.float32)

    @pl.when(k == pl.num_programs(1) - 1)
    def _finalize():
        counts = jnp.sum(msk, axis=1, keepdims=True)             # (tB, 1)
        inv = pl.reciprocal(jnp.maximum(counts, jnp.float32(1.0)), approx=True)
        out_ref[...] = acc_ref[...] * inv                        # empty -> 0


def multilabel_embedding(labels_padded, mask, embedding, *,
                         tile_v=None, tile_b=None):
    """labels_padded: (B, L) int32, mask: (B, L) float32, embedding: (V, D) f32."""
    B, L = labels_padded.shape
    V, D = embedding.shape

    # Lane-dense output: pad D to a multiple of 128 (avoids masked vst stores).
    d_pad = _round_up(D, 128)
    # B tile: whole (padded) batch for small B, 128-row blocks for large B.
    if tile_b is None:
        tile_b = 128 if B >= 128 else _round_up(B, 8)
    b_pad = _round_up(B, tile_b)
    # V tile (reduction axis): <=512 rows keeps double-buffered f32 tiles well
    # inside v5e/v7x scoped VMEM for realistic D while feeding the MXU.
    if tile_v is None:
        tile_v = min(512, _round_up(V, 8))
    v_pad = _round_up(V, tile_v)

    labels_p = jnp.pad(labels_padded.astype(jnp.int32), ((0, b_pad - B), (0, 0)))
    mask_p = jnp.pad(mask.astype(jnp.float32), ((0, b_pad - B), (0, 0)))
    emb_p = jnp.pad(embedding.astype(jnp.float32),
                    ((0, v_pad - V), (0, d_pad - D)))

    kernel = functools.partial(_multilabel_embed_kernel,
                               tile_v=tile_v, num_slots=L)
    grid = (b_pad // tile_b, v_pad // tile_v)   # reduction (V) axis last

    out = pl.pallas_call(
        kernel,
        out_shape=jax.ShapeDtypeStruct((b_pad, d_pad), jnp.float32),
        grid_spec=pltpu.PrefetchScalarGridSpec(
            num_scalar_prefetch=0,
            grid=grid,
            in_specs=[
                pl.BlockSpec((tile_b, L), lambda i, k: (i, 0)),      # labels
                pl.BlockSpec((tile_b, L), lambda i, k: (i, 0)),      # mask
                pl.BlockSpec((tile_v, d_pad), lambda i, k: (k, 0)),  # E tile
            ],
            out_specs=pl.BlockSpec((tile_b, d_pad), lambda i, k: (i, 0)),
            scratch_shapes=[pltpu.VMEM((tile_b, d_pad), jnp.float32)],
        ),
        compiler_params=pltpu.CompilerParams(
            dimension_semantics=("parallel", "arbitrary"),
            vmem_limit_bytes=64 * 1024 * 1024,
        ),
    )(labels_p, mask_p, emb_p)

    return out[:B, :D]


def _reference(labels_padded, mask, embedding):
    # Pure-JAX reference of the PyTorch forward.
    gathered = jnp.take(embedding, labels_padded, axis=0)          # (B, L, D)
    summed = jnp.sum(gathered * mask[..., None], axis=1)           # (B, D)
    counts = jnp.sum(mask, axis=1, keepdims=True)                  # (B, 1)
    return summed / jnp.maximum(counts, 1.0)


if __name__ == "__main__":
    # TODO(synk): nn.Embedding raises on out-of-range indices; here OOR labels
    # would silently contribute zeros (not reproduced).
    num_labels = 10
    embed_dim = 32

    key = jax.random.PRNGKey(0)
    k_emb, k_lab, k_len, k_emb2 = jax.random.split(key, 4)

    # --- Test 1: the module's toy case (ragged lists, one empty) ------------
    embedding = jax.random.normal(k_emb, (num_labels, embed_dim), jnp.float32)
    label_lists = [[1, 2, 3], [], [0, 9], [4]]
    L_max = 4
    B = len(label_lists)
    labels_padded = jnp.array(
        [ll + [0] * (L_max - len(ll)) for ll in label_lists], dtype=jnp.int32)
    mask = jnp.array(
        [[1.0] * len(ll) + [0.0] * (L_max - len(ll)) for ll in label_lists],
        dtype=jnp.float32)

    # tile_v=8 forces two reduction steps -> exercises init/accumulate/finalize.
    out = multilabel_embedding(labels_padded, mask, embedding, tile_v=8)
    out = jax.block_until_ready(out)
    ref = _reference(labels_padded, mask, embedding)
    assert out.shape == (B, embed_dim)
    # Tolerance covers the EUP approximate reciprocal used for the mean.
    assert jnp.allclose(out, ref, atol=5e-3, rtol=5e-3), \
        float(jnp.max(jnp.abs(out - ref)))

    # --- Test 2: larger randomized case, 2-D grid (B tiles x V tiles) -------
    B2, L2, V2, D2 = 16, 6, 300, 64
    emb2 = jax.random.normal(k_emb2, (V2, D2), jnp.float32)
    labels2 = jax.random.randint(k_lab, (B2, L2), 0, V2, dtype=jnp.int32)
    lengths2 = jax.random.randint(k_len, (B2,), 0, L2 + 1)
    mask2 = (jnp.arange(L2)[None, :] < lengths2[:, None]).astype(jnp.float32)

    out2 = multilabel_embedding(labels2, mask2, emb2, tile_v=64, tile_b=8)
    out2 = jax.block_until_ready(out2)
    ref2 = _reference(labels2, mask2, emb2)
    assert out2.shape == (B2, D2)
    assert jnp.allclose(out2, ref2, atol=5e-3, rtol=5e-3), \
        float(jnp.max(jnp.abs(out2 - ref2)))

    print("KERNEL_OK")
</pallas_src>

<mosaic_0001>
module attributes {stable_mosaic.version = 11 : i64} {
  func.func @_multilabel_embed_kernel(%arg0: i32, %arg1: i32, %arg2: memref<8x4xi32, #tpu.memory_space<vmem>>, %arg3: memref<8x4xf32, #tpu.memory_space<vmem>>, %arg4: memref<8x128xf32, #tpu.memory_space<vmem>>, %arg5: memref<8x128xf32, #tpu.memory_space<vmem>>, %arg6: memref<8x128xf32, #tpu.memory_space<vmem>>) attributes {dimension_semantics = [#tpu.dimension_semantics<parallel>, #tpu.dimension_semantics<arbitrary>], iteration_bounds = array<i64: 1, 2>, scalar_prefetch = 0 : i64, scratch_operands = 1 : i64, tpu.core_type = #tpu.core_type<tc>, window_params = [{transform_indices = @transform_0, window_bounds = array<i64: 8, 4>}, {transform_indices = @transform_1, window_bounds = array<i64: 8, 4>}, {transform_indices = @transform_2, window_bounds = array<i64: 8, 128>}, {transform_indices = @transform_3, window_bounds = array<i64: 8, 128>}]} {
    %c0_i32 = arith.constant 0 : i32
    %0 = arith.cmpi eq, %arg1, %c0_i32 : i32
    %1 = arith.extui %0 : i1 to i32
    %c0_i32_0 = arith.constant 0 : i32
    %2 = arith.cmpi ne, %1, %c0_i32_0 : i32
    scf.if %2 {
      %cst_16 = arith.constant 0.000000e+00 : f32
      %54 = vector.broadcast %cst_16 : f32 to vector<8x128xf32>
      %c0_17 = arith.constant 0 : index
      %c0_18 = arith.constant 0 : index
      %55 = vector.load %arg6[%c0_17, %c0_18] : memref<8x128xf32, #tpu.memory_space<vmem>>, vector<8x128xf32>
      tpu.vector_store %arg6[%c0_17, %c0_18], %54 {strides = array<i32>} : memref<8x128xf32, #tpu.memory_space<vmem>>, vector<8x128xf32>,
    } else {
    }
    %c0 = arith.constant 0 : index
    %c0_1 = arith.constant 0 : index
    %3 = vector.load %arg2[%c0, %c0_1] : memref<8x4xi32, #tpu.memory_space<vmem>>, vector<8x4xi32>
    %c0_2 = arith.constant 0 : index
    %c0_3 = arith.constant 0 : index
    %4 = vector.load %arg3[%c0_2, %c0_3] : memref<8x4xf32, #tpu.memory_space<vmem>>, vector<8x4xf32>
    %c0_4 = arith.constant 0 : index
    %c0_5 = arith.constant 0 : index
    %5 = vector.load %arg4[%c0_4, %c0_5] : memref<8x128xf32, #tpu.memory_space<vmem>>, vector<8x128xf32>
    %c8_i32 = arith.constant 8 : i32
    %6 = arith.muli %arg1, %c8_i32 : i32
    %7 = tpu.iota {dimensions = array<i32: 1>} : vector<8x8xi32>
    %8 = vector.broadcast %6 : i32 to vector<8x8xi32>
    %9 = arith.addi %7, %8 : vector<8x8xi32>
    %cst = arith.constant 0.000000e+00 : f32
    %10 = vector.broadcast %cst : f32 to vector<8x8xf32>
    %11 = vector.extract_strided_slice %3 {offsets = [0, 0], sizes = [8, 1], strides = [1, 1]} : vector<8x4xi32> to vector<8x1xi32>
    %12 = vector.extract_strided_slice %4 {offsets = [0, 0], sizes = [8, 1], strides = [1, 1]} : vector<8x4xf32> to vector<8x1xf32>
    %13 = vector.broadcast %11 : vector<8x1xi32> to vector<8x8xi32>
    %14 = arith.cmpi eq, %13, %9 : vector<8x8xi32>
    %cst_6 = arith.constant 0.000000e+00 : f32
    %15 = vector.shape_cast %12 : vector<8x1xf32> to vector<8x1xf32>
    %16 = vector.broadcast %15 : vector<8x1xf32> to vector<8x8xf32>
    %17 = vector.broadcast %cst_6 : f32 to vector<8x8xf32>
    %18 = arith.select %14, %16, %17 : vector<8x8xi1>, vector<8x8xf32>
    %19 = arith.addf %10, %18 : vector<8x8xf32>
    %20 = vector.extract_strided_slice %3 {offsets = [0, 1], sizes = [8, 1], strides = [1, 1]} : vector<8x4xi32> to vector<8x1xi32>
    %21 = vector.extract_strided_slice %4 {offsets = [0, 1], sizes = [8, 1], strides = [1, 1]} : vector<8x4xf32> to vector<8x1xf32>
    %22 = vector.broadcast %20 : vector<8x1xi32> to vector<8x8xi32>
    %23 = arith.cmpi eq, %22, %9 : vector<8x8xi32>
    %cst_7 = arith.constant 0.000000e+00 : f32
    %24 = vector.shape_cast %21 : vector<8x1xf32> to vector<8x1xf32>
    %25 = vector.broadcast %24 : vector<8x1xf32> to vector<8x8xf32>
    %26 = vector.broadcast %cst_7 : f32 to vector<8x8xf32>
    %27 = arith.select %23, %25, %26 : vector<8x8xi1>, vector<8x8xf32>
    %28 = arith.addf %19, %27 : vector<8x8xf32>
    %29 = vector.extract_strided_slice %3 {offsets = [0, 2], sizes = [8, 1], strides = [1, 1]} : vector<8x4xi32> to vector<8x1xi32>
    %30 = vector.extract_strided_slice %4 {offsets = [0, 2], sizes = [8, 1], strides = [1, 1]} : vector<8x4xf32> to vector<8x1xf32>
    %31 = vector.broadcast %29 : vector<8x1xi32> to vector<8x8xi32>
    %32 = arith.cmpi eq, %31, %9 : vector<8x8xi32>
    %cst_8 = arith.constant 0.000000e+00 : f32
    %33 = vector.shape_cast %30 : vector<8x1xf32> to vector<8x1xf32>
    %34 = vector.broadcast %33 : vector<8x1xf32> to vector<8x8xf32>
    %35 = vector.broadcast %cst_8 : f32 to vector<8x8xf32>
    %36 = arith.select %32, %34, %35 : vector<8x8xi1>, vector<8x8xf32>
    %37 = arith.addf %28, %36 : vector<8x8xf32>
    %38 = vector.extract_strided_slice %3 {offsets = [0, 3], sizes = [8, 1], strides = [1, 1]} : vector<8x4xi32> to vector<8x1xi32>
    %39 = vector.extract_strided_slice %4 {offsets = [0, 3], sizes = [8, 1], strides = [1, 1]} : vector<8x4xf32> to vector<8x1xf32>
    %40 = vector.broadcast %38 : vector<8x1xi32> to vector<8x8xi32>
    %41 = arith.cmpi eq, %40, %9 : vector<8x8xi32>
    %cst_9 = arith.constant 0.000000e+00 : f32
    %42 = vector.shape_cast %39 : vector<8x1xf32> to vector<8x1xf32>
    %43 = vector.broadcast %42 : vector<8x1xf32> to vector<8x8xf32>
    %44 = vector.broadcast %cst_9 : f32 to vector<8x8xf32>
    %45 = arith.select %41, %43, %44 : vector<8x8xi1>, vector<8x8xf32>
    %46 = arith.addf %37, %45 : vector<8x8xf32>
    %c0_10 = arith.constant 0 : index
    %c0_11 = arith.constant 0 : index
    %47 = vector.load %arg6[%c0_10, %c0_11] : memref<8x128xf32, #tpu.memory_space<vmem>>, vector<8x128xf32>
    %cst_12 = arith.constant dense<0.000000e+00> : vector<8x128xf32>
    %48 = tpu.matmul %46, %5, %cst_12 {dimension_numbers = #tpu.dot_dimension_numbers<[1], [0], [0], [1], [0, 0, 1, 1], [], []>} : vector<8x8xf32>, vector<8x128xf32>, vector<8x128xf32> -> vector<8x128xf32>
    %49 = arith.addf %47, %48 : vector<8x128xf32>
    %c0_13 = arith.constant 0 : index
    %c0_14 = arith.constant 0 : index
    %50 = vector.load %arg6[%c0_13, %c0_14] : memref<8x128xf32, #tpu.memory_space<vmem>>, vector<8x128xf32>
    tpu.vector_store %arg6[%c0_13, %c0_14], %49 {strides = array<i32>} : memref<8x128xf32, #tpu.memory_space<vmem>>, vector<8x128xf32>,
    %c1_i32 = arith.constant 1 : i32
    %51 = arith.cmpi eq, %arg1, %c1_i32 : i32
    %52 = arith.extui %51 : i1 to i32
    %c0_i32_15 = arith.constant 0 : i32
    %53 = arith.cmpi ne, %52, %c0_i32_15 : i32
    scf.if %53 {
      %cst_16 = arith.constant dense<0.000000e+00> : vector<8xf32>
      %54 = vector.multi_reduction <add>, %4, %cst_16 [1] : vector<8x4xf32> to vector<8xf32>
      %55 = vector.shape_cast %54 : vector<8xf32> to vector<8x1xf32>
      %cst_17 = arith.constant 1.000000e+00 : f32
      %56 = vector.broadcast %cst_17 : f32 to vector<8x1xf32>
      %57 = arith.maximumf %55, %56 : vector<8x1xf32>
      %58 = tpu.reciprocal %57 {approx = true} : vector<8x1xf32> -> vector<8x1xf32>
      %c0_18 = arith.constant 0 : index
      %c0_19 = arith.constant 0 : index
      %59 = vector.load %arg6[%c0_18, %c0_19] : memref<8x128xf32, #tpu.memory_space<vmem>>, vector<8x128xf32>
      %60 = vector.broadcast %58 : vector<8x1xf32> to vector<8x128xf32>
      %61 = arith.mulf %59, %60 : vector<8x128xf32>
      %c0_20 = arith.constant 0 : index
      %c0_21 = arith.constant 0 : index
      %62 = vector.load %arg5[%c0_20, %c0_21] : memref<8x128xf32, #tpu.memory_space<vmem>>, vector<8x128xf32>
      tpu.vector_store %arg5[%c0_20, %c0_21], %61 {strides = array<i32>} : memref<8x128xf32, #tpu.memory_space<vmem>>, vector<8x128xf32>,
    } else {
    }
    return
  }
  func.func @transform_0(%arg0: i32, %arg1: i32) -> (i32, i32) {
    %c0_i32 = arith.constant 0 : i32
    %c0_i32_0 = arith.constant 0 : i32
    return %arg0, %c0_i32 : i32, i32
  }
  func.func @transform_1(%arg0: i32, %arg1: i32) -> (i32, i32) {
    %c0_i32 = arith.constant 0 : i32
    %c0_i32_0 = arith.constant 0 : i32
    return %arg0, %c0_i32 : i32, i32
  }
  func.func @transform_2(%arg0: i32, %arg1: i32) -> (i32, i32) {
    %c0_i32 = arith.constant 0 : i32
    %c0_i32_0 = arith.constant 0 : i32
    return %arg1, %c0_i32 : i32, i32
  }
  func.func @transform_3(%arg0: i32, %arg1: i32) -> (i32, i32) {
    %c0_i32 = arith.constant 0 : i32
    %c0_i32_0 = arith.constant 0 : i32
    return %arg0, %c0_i32 : i32, i32
  }
}

</mosaic_0001>

<bundles_post_ra>
// kernel: tpu_custom_call.1
= control target key start
LH: loop header
LB: loop body
LE: loop exit
PB: predicated region body
PF: predicated region fallthrough
CT: control target
= control target key end

     0   :  { %8 = vsyncpa [#allocation4], 0  ;;  %s533_s12 = smov 0   ;;  %s535_s13 = smov 0   ;;  %s582_s0 = inlined_call_operand.vmem [shape: s32[8,4], index: 0, kind: input, shape index: {}]   ;;  %s583_s1 = inlined_call_operand.vmem [shape: f32[8,4], index: 1, kind: input, shape index: {}]   ;;  %s584_s2 = inlined_call_operand.vmem [shape: f32[16,128], index: 2, kind: input, shape index: {}]   ;;  %s585_s3 = inlined_call_operand.hbm [shape: f32[8,128], index: 3, kind: output, shape index: {}]  }
   0x1   :  { %s537_s14 = smov 0  }
   0x2 LB: > { %s390_s15 = sadd.s32 4294967295, %s505_s14   ;;  %s23_s16 = sadd.s32 1, %s501_s13  ;;  %s505_s14 = sphi %s537_s14, %s14_s14   ;;  %s501_s13 = sphi %s535_s13, %s587_s13   ;;  %s497_s12 = sphi %s533_s12, %s586_s12  }
   0x3   : > { %p24_p0 = scmp.ge.s32.totalorder %s23_s16, 2  ;;  %p395_p1 = scmp.ge.s32.totalorder %s505_s14, 1 }
   0x4   : > { %p167_p2 = scmp.lt.s32.totalorder %s505_s14, 3 }
   0x5   : > { %s589_s16 = smov (%p24_p0, %s23_s16), 0 }
   0x6   : > { %p168_p3 = pnand %p395_p1, %p167_p2 }
   0x7   : > { %p201_p4 = scmp.lt.s32.totalorder (!%p168_p3), %s497_s12, 1  ;;  %p397_p5 = scmp.ne.s32.totalorder (!%p168_p3), %s497_s12, 0 }
   0x8   : > { %171 = sbr.rel (%p168_p3) target bundleno = 425 (0x1a9), region = 32 }
   0xd   : > { %s202_s17 = scalar_select %p201_p4, %s497_s12, 1 }
   0xe   : > { %208 = sbr.rel (%p397_p5) target bundleno = 21 (0x15), region = 36 }
   0xf   : > { %s396_s18 = sshll.u32 %s202_s17, 3 }
  0x10   : > { %s204_s21 = scalar_lea.vmem %s584_s2, %s396_s18 }
  0x13   : > { %v507_v0 = vmov 0.0  }
  0x14   : > { %209 = vst [vmem:[#allocation2] sm:$0xff] %v507_v0 }
  0x15 PF: > { %v211_v1 = vld [vmem:[%s583_s1] sm:$0xff]  ;;  %v508_v3 = vmov 0   ;;  %v509_v4 = vmov 2   ;;  %v510_v5 = vmov 1   ;;  %v511_v6 = vmov 3   ;;  %s398_s26 = sshll.u32 %s497_s12, 3 }
  0x16   : > { %v210_v2 = vld [vmem:[%s582_s0] sm:$0xff]  ;;  %443 = vset.pattern.permute.xlu1 %v508_v3  ;;  %441 = vset.pattern.permute.xlu0 %v508_v3  ;;  %v214_v9 = vlaneseq  ;;  %v216_v13 = vstv %s398_s26  ;;  %vm260_vm4 = vcmask 64512   ;;  %p400_p6 = scmp.ne.s32.totalorder %s497_s12, 1 }
  0x17   : > { %224 = vperm.xlu1 %443, %v211_v1   ;;  %219 = vperm.xlu0 %441, %v210_v2   ;;  %v212_v7 = vld [vmem:[%s204_s21] sm:$0xff] }
  0x18   : > { %445 = vset.pattern.permute.xlu2 %v509_v4  ;;  %279 = vmatpush.msra.mxu0 %v212_v7  ;;  %v215_v12 = vand.u32 127, %v214_v9 }
  0x19   : > { %240 = vperm.xlu2 %445, %v210_v2  }
  0x1a   : > { %v217_v14 = vadd.s32 %v216_v13, %v215_v12 }
  0x1b   : > { %v259_v27 = vld [vmem:[#allocation2] sm:$0xff] }
  0x1f   : > { %444 = vset.pattern.permute.xlu1 %v510_v5  ;;  %442 = vset.pattern.permute.xlu0 %v510_v5 }
  0x20   : > { %234 = vperm.xlu1 %444, %v211_v1   ;;  %230 = vperm.xlu0 %442, %v210_v2  }
  0x21   : > { %244 = vperm.xlu2 %445, %v211_v1  }
  0x28   : > { %446 = vset.pattern.permute.xlu1 %v511_v6  ;;  %448 = vset.pattern.permute.xlu0 %v511_v6 }
  0x29   : > { %250 = vperm.xlu1 %446, %v210_v2   ;;  %447 = vset.pattern.permute.xlu2 %v511_v6 }
  0x2a   : > { %254 = vperm.xlu2 %447, %v211_v1  }
  0x73   : > { %v241_v8 = vpop.permute.xlu2 %240 }
  0x74   : > { %vm242_vm2 = vcmp.eq.s32.totalorder %v241_v8, %v217_v14 }
  0x7b   : > { %v245_v15 = vpop.permute.xlu2 %244 }
  0x7c   : > { %v247_v22 = vsel %vm242_vm2, %v245_v15, 0.0 }
  0x84   : > { %v255_v21 = vpop.permute.xlu2 %254 }
  0x89   : > { %v225_v10 = vpop.permute.xlu1 %224  ;;  %v220_v11 = vpop.permute.xlu0 %219 }
  0x8a   : > { %vm221_vm1 = vcmp.eq.s32.totalorder %v220_v11, %v217_v14 }
  0x8b   : > { %v227_v19 = vsel %vm221_vm1, %v225_v10, 0.0 }
  0x92   : > { %v235_v16 = vpop.permute.xlu1 %234  ;;  %v231_v17 = vpop.permute.xlu0 %230 }
  0x93   : > { %vm232_vm0 = vcmp.eq.s32.totalorder %v231_v17, %v217_v14 }
  0x94   : > { %v237_v18 = vsel %vm232_vm0, %v235_v16, 0.0 }
  0x95   : > { %v238_v20 = vadd.f32 %v237_v18, %v227_v19 }
  0x97   : > { %v248_v24 = vadd.f32 %v247_v22, %v238_v20 }
  0x9b   : > { %v251_v23 = vpop.permute.xlu1 %250 }
  0x9c   : > { %vm252_vm3 = vcmp.eq.s32.totalorder %v251_v23, %v217_v14 }
  0x9d   : > { %v257_v25 = vsel %vm252_vm3, %v255_v21, 0.0 }
  0x9e   : > { %v258_v26 = vadd.f32 %v257_v25, %v248_v24 }
  0xa0   : > { %399 = vmatmul.msk.f32.vlgmr.msra.gmra.mxu0 %vm260_vm4, %v258_v26 }
 0x11c   : > { %289 = sbr.rel (%p400_p6) target bundleno = 419 (0x1a3), region = 40 }
 0x11d   : > { %v281_v28 = vpop.f32.mrf.mxu0 }
 0x11e   : > { %v284_v29 = vadd.f32 %v281_v28, %v259_v27 }
 0x120   : > { %285 = vst [vmem:[#allocation2] sm:$0xff] %v284_v29 }
 0x121   : > { %vm290_vm5 = vcmask 31744  }
 0x122   : > { %v291_v30 = vsel %vm290_vm5, %v211_v1, 0.0 }
 0x123   : > { %292 = vadd.xlane.f32.xlu0 %v291_v30 }
 0x127   : > { %v296_v33 = vld [vmem:[#allocation2] sm:$0xff] }
 0x196   : > { %v293_v31 = vpop.xlane.xlu0 %292 }
 0x197   : > { %v294_v32 = vmax.f32 %v293_v31, 1.0 }
 0x199   : > { %449 = vrcp.f32 %v294_v32 }
 0x19f   : > { %v450_v34 = vpop.eup %449 }
 0x1a0   : > { %v297_v35 = vmul.f32 %v450_v34, %v296_v33 }
 0x1a2   : > { %298 = vst [vmem:[#allocation3] sm:$0xff] %v297_v35 }
 0x1a3 PF: > { %p409_p7 = scmp.eq.s32.totalorder %s390_s15, 1  ;;  %s309_s29 = sshll.u32 %s585_s3, 4  ;;  %s310_s29 = int_to_ptr.hbm [resolvable:$true] %s309_s29 }
 0x1a4   : > { %s512_s30 = smov [#allocation3]  }
 0x1a5   : > { %s307_s4 = sshll.u32 %s512_s30, 4  ;;  %s308_s4 = int_to_ptr.vmem [resolvable:$true] %s307_s4 }
 0x1a6   : > { %406 = dma.vmem_to_hbm [thread:$0]  (%p409_p7), %s308_s4, 128, %s310_s29, [#allocation4]  }
 0x1a7   : > { %492 = dma.done.wait (%p409_p7), [#allocation4], 128  }
 0x1a8   : > { %494 = vsyncadd (%p409_p7), [#allocation4], 4294967168 }
 0x1a9 PF: > { %s14_s14 = sadd.s32 1, %s505_s14   ;;  %s586_s12 = smov %s501_s13 }
 0x1aa   : > { %p11_p8 = scmp.ge.s32.totalorder %s14_s14, 4   ;;  %s587_s13 = smov %s589_s16 }
 0x1ac   :  { %13 = sbr.rel (!%p11_p8) target bundleno = 2 (0x2), region = 74 }
 0x1b1   :  { %323 = vsyncpa [#allocation4], 1 }
 0x1b2   :  { %325 = vsyncpa [#allocation4 + $0x1], 1 }

</bundles_post_ra>
